<compile_context>
chip_gen: v6e
topology: v6e:2x2x1
jax: 0.10.0
libtpu: 0.0.40
codegen_flags: <defaults>
</compile_context>

<pallas_src>
import jax
import jax.numpy as jnp
from jax import lax
from jax.experimental import pallas as pl
from jax.experimental.pallas import tpu as pltpu

CONTEXT = 32      # matches `context` in GPT.py
EMB_DIMS = 128    # matches `emb_dims` in GPT.py
HEAD_SIZE = 32    # constructor argument head_size


def _decoder_head_kernel(x_ref, wqkv_ref, o_ref):
    # x_ref: (Bt, C, D) block; wqkv_ref: (D, 3H) fused bf16 weight
    # (scale already folded into the q segment); o_ref: (Bt, C, H).
    Bt, C, D = x_ref.shape
    H = o_ref.shape[-1]

    # --- fused QKV projection: one (Bt*C, D) @ (D, 3H) bf16 MXU pass -------
    x = x_ref[...].astype(jnp.bfloat16)               # (Bt, C, D)
    w_qkv = wqkv_ref[...]                              # (D, 3H), bf16

    qkv = jnp.dot(x.reshape(Bt * C, D), w_qkv,
                  preferred_element_type=jnp.float32)  # (Bt*C, 3H) f32 acc
    qkv = qkv.reshape(Bt, C, 3 * H)
    q = qkv[:, :, 0 * H:1 * H]                         # (Bt, C, H), pre-scaled
    k = qkv[:, :, 1 * H:2 * H]
    v = qkv[:, :, 2 * H:3 * H]

    # --- scores: batched contraction on head dim (no k transpose) ----------
    wei = jnp.einsum('bqh,bkh->bqk',
                     q.astype(jnp.bfloat16), k.astype(jnp.bfloat16),
                     preferred_element_type=jnp.float32)    # (Bt, C, C)

    # Causal (lower-triangular) mask.  Large finite negative: masked probs are
    # exactly 0 after exp underflow, and fully-masked rows can't produce NaN.
    row = lax.broadcasted_iota(jnp.int32, (C, C), 0)
    col = lax.broadcasted_iota(jnp.int32, (C, C), 1)
    wei = jnp.where((col <= row)[None, :, :], wei, jnp.float32(-1e30))

    # --- numerically stable softmax along the last dim (kept in f32) -------
    m = jnp.max(wei, axis=-1, keepdims=True)
    e = jnp.exp(wei - m)
    denom = jnp.sum(e, axis=-1, keepdims=True)
    p = e * pl.reciprocal(denom, approx=True)          # EUP reciprocal

    # --- output: P @ V (bf16 operands, f32 accumulation) -------------------
    out = jnp.einsum('bqk,bkh->bqh',
                     p.astype(jnp.bfloat16), v.astype(jnp.bfloat16),
                     preferred_element_type=jnp.float32)    # (Bt, C, H)
    o_ref[...] = out.astype(o_ref.dtype)


def fuse_qkv_weights(wk, wq, wv):
    """One-time (init-time) weight fusion.

    Concatenates [wq | wk | wv] into a single (D, 3H) operand, folds the
    head_size**-0.5 attention scale into the q segment, and casts to bf16
    for the MXU.  Do this once when building parameters, NOT per forward call.
    """
    H = wq.shape[1]
    scale = jnp.float32(H) ** -0.5
    w_qkv = jnp.concatenate([wq * scale, wk, wv], axis=1)   # (D, 3H)
    return w_qkv.astype(jnp.bfloat16)


def decoder_head(x, w_qkv_fused, *, batch_tiles=1):
    """x: (B, C, D) float32; w_qkv_fused: (D, 3H) bf16 from fuse_qkv_weights.

    batch_tiles=1 (default) folds the whole batch into one grid step — best on
    single-TC v5e/v6e and also the right choice on v7x at small B.  Only use
    batch_tiles=2 on v7x once each core gets >= ~256 rows of M (B*C/2 >= 256),
    otherwise per-step pipeline overhead dominates and the 256-row MXU starves.
    """
    B, C, D = x.shape
    H3 = w_qkv_fused.shape[1]
    H = H3 // 3
    assert B % batch_tiles == 0
    Bt = B // batch_tiles

    cost = pl.CostEstimate(
        flops=2 * B * C * D * H3 + 4 * B * C * C * H,
        transcendentals=B * C * C,                               # exp
        bytes_accessed=(x.size * x.dtype.itemsize
                        + w_qkv_fused.size * w_qkv_fused.dtype.itemsize
                        + B * C * H * x.dtype.itemsize),
    )

    return pl.pallas_call(
        _decoder_head_kernel,
        out_shape=jax.ShapeDtypeStruct((B, C, H), x.dtype),
        grid_spec=pltpu.PrefetchScalarGridSpec(
            num_scalar_prefetch=0,
            grid=(batch_tiles,),
            in_specs=[
                pl.BlockSpec((Bt, C, D), lambda i: (i, 0, 0)),
                # Constant index_map: weight stays resident, not re-DMA'd/step.
                pl.BlockSpec((D, H3), lambda i: (0, 0)),
            ],
            out_specs=pl.BlockSpec((Bt, C, H), lambda i: (i, 0, 0)),
        ),
        compiler_params=pltpu.CompilerParams(
            dimension_semantics=("parallel",)),
        cost_estimate=cost,
    )(x, w_qkv_fused)


def decoder_head_ref(x, wk, wq, wv):
    """Pure-JAX f32 reference matching the PyTorch module."""
    k = x @ wk
    q = x @ wq
    v = x @ wv
    wei = (q @ jnp.swapaxes(k, -1, -2)) * (HEAD_SIZE ** -0.5)
    C = x.shape[1]
    mask = jnp.tril(jnp.ones((C, C), dtype=bool))
    wei = jnp.where(mask, wei, -jnp.inf)
    wei = jax.nn.softmax(wei, axis=-1)
    return wei @ v


if __name__ == "__main__":
    key = jax.random.PRNGKey(0)
    kx, kk, kq, kv = jax.random.split(key, 4)

    B, C, D, H = 2, CONTEXT, EMB_DIMS, HEAD_SIZE
    x = jax.random.normal(kx, (B, C, D), dtype=jnp.float32)

    # Deterministic "Linear" weights; PyTorch stores (H, D), we pass transposed (D, H).
    bound = 1.0 / (D ** 0.5)
    wk = jax.random.uniform(kk, (D, H), jnp.float32, -bound, bound)
    wq = jax.random.uniform(kq, (D, H), jnp.float32, -bound, bound)
    wv = jax.random.uniform(kv, (D, H), jnp.float32, -bound, bound)

    # Init-time weight fusion (outside the per-call path).
    w_qkv = fuse_qkv_weights(wk, wq, wv)

    out = decoder_head(x, w_qkv)
    out = jax.block_until_ready(out)

    ref = decoder_head_ref(x, wk, wq, wv)
    assert out.shape == (B, C, H)
    # bf16 MXU operands (f32 accumulation) + approx reciprocal in the softmax
    # epilogue vs. a pure-f32 reference -> looser tolerance.
    assert jnp.allclose(out, ref, atol=5e-2, rtol=5e-2)

    print("KERNEL_OK")
</pallas_src>

<mosaic_0001>
module attributes {stable_mosaic.version = 11 : i64} {
  func.func @_decoder_head_kernel(%arg0: i32, %arg1: memref<2x32x128xf32, #tpu.memory_space<vmem>>, %arg2: memref<128x96xbf16, #tpu.memory_space<vmem>>, %arg3: memref<2x32x32xf32, #tpu.memory_space<vmem>>) attributes {dimension_semantics = [#tpu.dimension_semantics<parallel>], iteration_bounds = array<i64: 1>, scalar_prefetch = 0 : i64, scratch_operands = 0 : i64, tpu.core_type = #tpu.core_type<tc>, window_params = [{transform_indices = @transform_0, window_bounds = array<i64: 2, 32, 128>}, {pipeline_mode = #tpu.pipeline_mode<synchronous>, transform_indices = @transform_1, window_bounds = array<i64: 128, 96>}, {transform_indices = @transform_2, window_bounds = array<i64: 2, 32, 32>}]} {
    %c0 = arith.constant 0 : index
    %c0_0 = arith.constant 0 : index
    %c0_1 = arith.constant 0 : index
    %0 = vector.load %arg1[%c0, %c0_0, %c0_1] : memref<2x32x128xf32, #tpu.memory_space<vmem>>, vector<2x32x128xf32>
    %1 = arith.truncf %0 : vector<2x32x128xf32> to vector<2x32x128xbf16>
    %c0_2 = arith.constant 0 : index
    %c0_3 = arith.constant 0 : index
    %2 = vector.load %arg2[%c0_2, %c0_3] : memref<128x96xbf16, #tpu.memory_space<vmem>>, vector<128x96xbf16>
    %3 = vector.shape_cast %1 : vector<2x32x128xbf16> to vector<64x128xbf16>
    %cst = arith.constant dense<0.000000e+00> : vector<64x96xf32>
    %4 = tpu.matmul %3, %2, %cst {dimension_numbers = #tpu.dot_dimension_numbers<[1], [0], [0], [1], [0, 0, 1, 1], [], []>} : vector<64x128xbf16>, vector<128x96xbf16>, vector<64x96xf32> -> vector<64x96xf32>
    %5 = vector.shape_cast %4 : vector<64x96xf32> to vector<2x32x96xf32>
    %6 = vector.extract_strided_slice %5 {offsets = [0, 0, 0], sizes = [2, 32, 32], strides = [1, 1, 1]} : vector<2x32x96xf32> to vector<2x32x32xf32>
    %7 = vector.extract_strided_slice %5 {offsets = [0, 0, 32], sizes = [2, 32, 32], strides = [1, 1, 1]} : vector<2x32x96xf32> to vector<2x32x32xf32>
    %8 = vector.extract_strided_slice %5 {offsets = [0, 0, 64], sizes = [2, 32, 32], strides = [1, 1, 1]} : vector<2x32x96xf32> to vector<2x32x32xf32>
    %9 = arith.truncf %6 : vector<2x32x32xf32> to vector<2x32x32xbf16>
    %10 = arith.truncf %7 : vector<2x32x32xf32> to vector<2x32x32xbf16>
    "tpu.trace_start"() <{level = 10 : i32, message = "bqh,bkh->bqk"}> : () -> ()
    %cst_4 = arith.constant dense<0.000000e+00> : vector<2x32x32xf32>
    %11 = tpu.matmul %9, %10, %cst_4 {dimension_numbers = #tpu.dot_dimension_numbers<[2], [2], [1], [1], [0, 0, 0, 1, 1, 1], [0], [0]>} : vector<2x32x32xbf16>, vector<2x32x32xbf16>, vector<2x32x32xf32> -> vector<2x32x32xf32>
    "tpu.trace_stop"() : () -> ()
    %12 = tpu.iota {dimensions = array<i32: 0>} : vector<32x32xi32>
    %13 = tpu.iota {dimensions = array<i32: 1>} : vector<32x32xi32>
    %14 = arith.cmpi sle, %13, %12 : vector<32x32xi32>
    %15 = vector.shape_cast %14 : vector<32x32xi1> to vector<1x32x32xi1>
    %cst_5 = arith.constant -1.000000e+30 : f32
    %16 = vector.shape_cast %15 : vector<1x32x32xi1> to vector<1x32x32xi1>
    %17 = vector.broadcast %16 : vector<1x32x32xi1> to vector<2x32x32xi1>
    %18 = vector.broadcast %cst_5 : f32 to vector<2x32x32xf32>
    %19 = arith.select %17, %11, %18 : vector<2x32x32xi1>, vector<2x32x32xf32>
    %cst_6 = arith.constant dense<0xFF800000> : vector<2x32xf32>
    %20 = vector.multi_reduction <maximumf>, %19, %cst_6 [2] : vector<2x32x32xf32> to vector<2x32xf32>
    %21 = vector.shape_cast %20 : vector<2x32xf32> to vector<2x32x1xf32>
    %22 = vector.broadcast %21 : vector<2x32x1xf32> to vector<2x32x32xf32>
    %23 = arith.subf %19, %22 : vector<2x32x32xf32>
    %24 = math.exp %23 : vector<2x32x32xf32>
    %cst_7 = arith.constant dense<0.000000e+00> : vector<2x32xf32>
    %25 = vector.multi_reduction <add>, %24, %cst_7 [2] : vector<2x32x32xf32> to vector<2x32xf32>
    %26 = vector.shape_cast %25 : vector<2x32xf32> to vector<2x32x1xf32>
    %27 = tpu.reciprocal %26 {approx = true} : vector<2x32x1xf32> -> vector<2x32x1xf32>
    %28 = vector.broadcast %27 : vector<2x32x1xf32> to vector<2x32x32xf32>
    %29 = arith.mulf %24, %28 : vector<2x32x32xf32>
    %30 = arith.truncf %29 : vector<2x32x32xf32> to vector<2x32x32xbf16>
    %31 = arith.truncf %8 : vector<2x32x32xf32> to vector<2x32x32xbf16>
    "tpu.trace_start"() <{level = 10 : i32, message = "bqk,bkh->bqh"}> : () -> ()
    %cst_8 = arith.constant dense<0.000000e+00> : vector<2x32x32xf32>
    %32 = tpu.matmul %30, %31, %cst_8 {dimension_numbers = #tpu.dot_dimension_numbers<[2], [1], [1], [2], [0, 0, 0, 1, 1, 2], [0], [0]>} : vector<2x32x32xbf16>, vector<2x32x32xbf16>, vector<2x32x32xf32> -> vector<2x32x32xf32>
    "tpu.trace_stop"() : () -> ()
    %c0_9 = arith.constant 0 : index
    %c0_10 = arith.constant 0 : index
    %c0_11 = arith.constant 0 : index
    %33 = vector.load %arg3[%c0_9, %c0_10, %c0_11] : memref<2x32x32xf32, #tpu.memory_space<vmem>>, vector<2x32x32xf32>
    tpu.vector_store %arg3[%c0_9, %c0_10, %c0_11], %32 {strides = array<i32>} : memref<2x32x32xf32, #tpu.memory_space<vmem>>, vector<2x32x32xf32>,
    return
  }
  func.func @transform_0(%arg0: i32) -> (i32, i32, i32) {
    %c0_i32 = arith.constant 0 : i32
    %c0_i32_0 = arith.constant 0 : i32
    %c0_i32_1 = arith.constant 0 : i32
    return %arg0, %c0_i32, %c0_i32_0 : i32, i32, i32
  }
  func.func @transform_1(%arg0: i32) -> (i32, i32) {
    %c0_i32 = arith.constant 0 : i32
    %c0_i32_0 = arith.constant 0 : i32
    %c0_i32_1 = arith.constant 0 : i32
    return %c0_i32, %c0_i32_0 : i32, i32
  }
  func.func @transform_2(%arg0: i32) -> (i32, i32, i32) {
    %c0_i32 = arith.constant 0 : i32
    %c0_i32_0 = arith.constant 0 : i32
    %c0_i32_1 = arith.constant 0 : i32
    return %arg0, %c0_i32, %c0_i32_0 : i32, i32, i32
  }
}

</mosaic_0001>

<bundles_post_ra>
// kernel: tpu_custom_call.1
= control target key start
LH: loop header
LB: loop body
LE: loop exit
PB: predicated region body
PF: predicated region fallthrough
CT: control target
= control target key end

     0   :  { %s876_s0 = inlined_call_operand.vmem [shape: f32[2,32,128], index: 0, kind: input, shape index: {}]   ;;  %s877_s1 = inlined_call_operand.vmem [shape: bf16[128,96], index: 1, kind: input, shape index: {}]   ;;  %s878_s2 = inlined_call_operand.hbm [shape: f32[2,32,32], index: 2, kind: output, shape index: {}]  }
   0x1   :  { %v667_v0 = vld [vmem:[%s877_s1 + $0x38] sm:$0xff]   ;;  %v668_v1 = vld [vmem:[%s877_s1 + $0x30] sm:$0xff]   ;;  %v669_v2 = vld [vmem:[%s877_s1 + $0x28] sm:$0xff]  }
   0x2   :  { %602 = vmatprep.subr.bf16.mxu0 %v667_v0  ;;  %v670_v3 = vld [vmem:[%s877_s1 + $0x20] sm:$0xff]   ;;  %v14_v5 = vld [vmem:[%s876_s0 + $0x8] sm:$0xff] }
   0x3   :  { %603 = vmatpush3.bf16.msra.mxu0 %v667_v0  ;;  %v13_v4 = vld [vmem:[%s876_s0] sm:$0xff] }
   0x4   :  { %604 = vmatprep.subr.bf16.mxu0 %v668_v1  ;;  %v21_v6 = vpack.c.bf16 %v14_v5, %v13_v4 }
   0x7   :  { %605 = vmatpush3.bf16.msra.mxu0 %v668_v1 }
   0x8   :  { %606 = vmatprep.subr.bf16.mxu0 %v669_v2 }
   0x9   :  { %7 = vsyncpa [#allocation3], 0  ;;  %618 = vmatprep.mubr.bf16.mxu0 %v21_v6  ;;  %v671_v7 = vld [vmem:[%s877_s1 + $0x18] sm:$0xff]   ;;  %v672_v8 = vld [vmem:[%s877_s1 + $0x10] sm:$0xff]   ;;  %vm164_vm0 = vcmask 261120   ;;  %s729_s12 = smov 96   ;;  %v293_v40 = vlaneseq }
   0xa   :  { %v673_v9 = vld [vmem:[%s877_s1 + $0x8] sm:$0xff]   ;;  %v674_v10 = vld [vmem:[%s877_s1] sm:$0xff]   ;;  %v15_v11 = vld [vmem:[%s876_s0 + $0x10] sm:$0xff]  ;;  %s731_s13 = smov [#allocation2]  }
   0xb   :  { %607 = vmatpush3.bf16.msra.mxu0 %v669_v2  ;;  %v16_v12 = vld [vmem:[%s876_s0 + $0x18] sm:$0xff]  ;;  %v17_v13 = vld [vmem:[%s876_s0 + $0x20] sm:$0xff]  ;;  %v18_v14 = vld [vmem:[%s876_s0 + $0x28] sm:$0xff]  ;;  %v294_v41 = vshrl.u32 %v293_v40, 7  ;;  %v299_v43 = vand.u32 127, %v293_v40  ;;  %s547_s14 = sshll.u32 %s731_s13, 4  ;;  %s548_s14 = int_to_ptr.vmem [resolvable:$true] %s547_s14 }
   0xc   :  { %608 = vmatprep.subr.bf16.mxu0 %v670_v3  ;;  %v22_v15 = vpack.c.bf16 %v16_v12, %v15_v11  ;;  %v23_v16 = vpack.c.bf16 %v18_v14, %v17_v13  ;;  %v19_v17 = vld [vmem:[%s876_s0 + $0x30] sm:$0xff]  ;;  %v20_v18 = vld [vmem:[%s876_s0 + $0x38] sm:$0xff]  ;;  %s730_s0 = smov 64   ;;  %s707_s15 = scalar_lea.vmem %s548_s14, 1024 }
   0xd   :  { %v24_v19 = vpack.c.bf16 %v20_v18, %v19_v17  ;;  %v296_v42 = vadd.s32 16, %v294_v41  ;;  %v297_v44 = vadd.s32 24, %v294_v41  ;;  %vm300_vm2 = vcmp.le.s32.totalorder %v299_v43, %v294_v41  ;;  %p708_p0 = scmp.ne.s32.totalorder %s548_s14, %s707_s15  ;;  %p712_p1 = scmp.lt.s32.totalorder %s548_s14, %s548_s14 }
   0xe   :  { %v295_v46 = vadd.s32 8, %v294_v41  ;;  %p713_p2 = scmp.lt.s32.totalorder %s707_s15, %s707_s15 }
   0xf   :  { %609 = vmatpush3.bf16.msra.mxu0 %v670_v3  ;;  %vm302_vm1 = vcmp.le.s32.totalorder %v299_v43, %v296_v42  ;;  %vm303_vm3 = vcmp.le.s32.totalorder %v299_v43, %v297_v44 }
  0x10   :  { %610 = vmatprep.subr.bf16.mxu0 %v671_v7  ;;  %vm301_vm4 = vcmp.le.s32.totalorder %v299_v43, %v295_v46  ;;  %p714_p3 = por %p713_p2, %p712_p1 }
  0x12   :  { %p715_p4 = pnand %p714_p3, %p708_p0 }
  0x13   :  { %611 = vmatpush3.bf16.msra.mxu0 %v671_v7 }
  0x14   :  { %612 = vmatprep.subr.bf16.mxu0 %v672_v8 }
  0x17   :  { %613 = vmatpush3.bf16.msra.mxu0 %v672_v8 }
  0x18   :  { %614 = vmatprep.subr.bf16.mxu0 %v673_v9 }
  0x1b   :  { %615 = vmatpush3.bf16.msra.mxu0 %v673_v9 }
  0x1c   :  { %616 = vmatprep.subr.bf16.mxu0 %v674_v10 }
  0x1f   :  { %617 = vmatpush3.bf16.msra.mxu0 %v674_v10 }
  0x22   :  { %619 = vmatmul.mubr.bf16.vlgmr.msra.gmra.mxu0 %v22_v15 }
  0x23   :  { %622 = vmatprep.mubr.bf16.mxu0 %v23_v16 }
  0x2a   :  { %623 = vmatmul.mubr.bf16.gmra.mxu0 %v24_v19 }
  0xe2   :  { %v620_v20 = vpop.f32.mrf.mxu0 }
  0xe4   :  { %v123_v21 = vpop.f32.mrf.mxu0 }
  0xe6   :  { %v621_v22 = vpop.f32.mrf.mxu0 }
  0xe7   :  { %v797_v23 = vpack.c.bf16 %v621_v22, %v620_v20 }
  0xe8   :  { %v126_v24 = vpop.f32.mrf.mxu0 }
  0xe9   :  { %v799_v25 = vpack.c.bf16 %v126_v24, %v123_v21  ;;  %162 = vrot.lane.b32.xlu0 %v797_v23, %s729_s12 }
  0xea   :  { %v624_v26 = vpop.f32.mrf.mxu0 }
  0xeb   :  { %630 = vmatprep.mubr.msk.bf16.mxu1 %vm164_vm0, %v799_v25 }
  0xec   :  { %v139_v27 = vpop.f32.mrf.mxu0 }
  0xed   :  { %160 = vrot.lane.b32.xlu0 %v799_v25, %s729_s12 }
  0xee   :  { %v625_v28 = vpop.f32.mrf.mxu0 }
  0xef   :  { %v805_v29 = vpack.c.bf16 %v625_v28, %v624_v26 }
  0xf0   :  { %v142_v30 = vpop.f32.mrf.mxu0 }
  0xf1   :  { %230 = vrot.lane.b32.xlu1 %v805_v29, %s729_s12  ;;  %v808_v31 = vpack.c.bf16 %v142_v30, %v139_v27 }
  0xf5   :  { %228 = vrot.lane.b32.xlu1 %v808_v31, %s729_s12 }
 0x15b   :  { %v163_v32 = vpop.permute.xlu0 %162 }
 0x15c   :  { %658 = vmatprep.subr.msk.bf16.mxu1 %vm164_vm0, %v163_v32  ;;  %v175_v33 = vsel %vm164_vm0, %v163_v32, 0 }
 0x15d   :  { %627 = vmatpush3.bf16.xpose.msra.mxu1 %v175_v33 }
 0x15f   :  { %v161_v34 = vpop.permute.xlu0 %160 }
 0x160   :  { %659 = vmatprep.subr.msk.bf16.mxu1 %vm164_vm0, %v161_v34  ;;  %v172_v35 = vsel %vm164_vm0, %v161_v34, 0 }
 0x163   :  { %v231_v36 = vpop.permute.xlu1 %230 }
 0x164   :  { %v242_v37 = vsel %vm164_vm0, %v231_v36, 0 }
 0x165   :  { %629 = vmatpush3.bf16.xpose.msra.mxu1 %v172_v35 }
 0x166   :  { %660 = vmatprep.subr.msk.bf16.mxu1 %vm164_vm0, %v231_v36 }
 0x167   :  { %v229_v38 = vpop.permute.xlu1 %228 }
 0x168   :  { %v239_v39 = vsel %vm164_vm0, %v229_v38, 0 }
 0x16c   :  { %631 = vmatmul.mubr.msk.bf16.vlgmr.msra.gmra.mxu1 %vm164_vm0, %v797_v23 }
 0x16d   :  { %635 = vmatpush3.bf16.xpose.msra.mxu1 %v242_v37  ;;  %638 = vmatprep.mubr.msk.bf16.mxu1 %vm164_vm0, %v808_v31 }
 0x16e   :  { %661 = vmatprep.subr.msk.bf16.mxu1 %vm164_vm0, %v229_v38 }
 0x175   :  { %637 = vmatpush3.bf16.xpose.msra.mxu1 %v239_v39 }
 0x17c   :  { %639 = vmatmul.mubr.msk.bf16.vlgmr.msra.gmra.mxu1 %vm164_vm0, %v805_v29 }
 0x22c   :  { %v632_v45 = vpop.f32.mrf.mxu1 }
 0x22d   :  { %v314_v47 = vsel %vm302_vm1, %v632_v45, -1e+30 }
 0x22e   :  { %v211_v48 = vpop.f32.mrf.mxu1  ;;  %v326_v49 = vsel %vm164_vm0, %v314_v47, -inf }
 0x22f   :  { %v312_v50 = vsel %vm300_vm2, %v211_v48, -1e+30  ;;  %327 = vmax.xlane.f32.xlu1 %v326_v49 }
 0x230   :  { %v633_v51 = vpop.f32.mrf.mxu1  ;;  %v320_v52 = vsel %vm164_vm0, %v312_v50, -inf }
 0x231   :  { %v315_v53 = vsel %vm303_vm3, %v633_v51, -1e+30  ;;  %321 = vmax.xlane.f32.xlu0 %v320_v52 }
 0x232   :  { %v214_v54 = vpop.f32.mrf.mxu1  ;;  %v329_v56 = vsel %vm164_vm0, %v315_v53, -inf }
 0x233   :  { %v313_v55 = vsel %vm301_vm4, %v214_v54, -1e+30 }
 0x234   :  { %v323_v57 = vsel %vm164_vm0, %v313_v55, -inf }
 0x235   :  { %330 = vmax.xlane.f32.xlu0 %v329_v56  ;;  %324 = vmax.xlane.f32.xlu1 %v323_v57 }
 0x23c   :  { %v640_v58 = vpop.f32.mrf.mxu1 }
 0x23d   :  { %v318_v59 = vsel %vm302_vm1, %v640_v58, -1e+30 }
 0x23e   :  { %v278_v60 = vpop.f32.mrf.mxu1  ;;  %v338_v61 = vsel %vm164_vm0, %v318_v59, -inf }
 0x23f   :  { %v316_v62 = vsel %vm300_vm2, %v278_v60, -1e+30  ;;  %339 = vmax.xlane.f32.xlu1 %v338_v61 }
 0x240   :  { %v641_v63 = vpop.f32.mrf.mxu1  ;;  %v332_v0 = vsel %vm164_vm0, %v316_v62, -inf }
 0x241   :  { %333 = vmax.xlane.f32.xlu0 %v332_v0  ;;  %v319_v4 = vsel %vm303_vm3, %v641_v63, -1e+30 }
 0x242   :  { %v281_v1 = vpop.f32.mrf.mxu1  ;;  %v341_v5 = vsel %vm164_vm0, %v319_v4, -inf }
 0x243   :  { %v317_v2 = vsel %vm301_vm4, %v281_v1, -1e+30 }
 0x244   :  { %v335_v3 = vsel %vm164_vm0, %v317_v2, -inf }
 0x245   :  { %336 = vmax.xlane.f32.xlu0 %v335_v3 }
 0x249   :  { %342 = vmax.xlane.f32.xlu0 %v341_v5 }
 0x250   :  { %414 = vrot.lane.b32.xlu1 %v797_v23, %s730_s0 }
 0x2b8   :  { %v328_v6 = vpop.xlane.xlu1 %327 }
 0x2b9   :  { %v346_v7 = vsub.f32 %v314_v47, %v328_v6 }
 0x2ba   :  { %v322_v8 = vpop.xlane.xlu0 %321 }
 0x2bb   :  { %v356_v9 = vmul.f32 1.442695, %v346_v7  ;;  %v344_v10 = vsub.f32 %v312_v50, %v322_v8 }
 0x2bd   :  { %675 = vpow2.f32 %v356_v9  ;;  %v352_v11 = vmul.f32 1.442695, %v344_v10 }
 0x2be   :  { %v331_v12 = vpop.xlane.xlu0 %330  ;;  %v325_v13 = vpop.xlane.xlu1 %324 }
 0x2bf   :  { %677 = vpow2.f32 %v352_v11  ;;  %v347_v14 = vsub.f32 %v315_v53, %v331_v12  ;;  %v345_v15 = vsub.f32 %v313_v55, %v325_v13 }
 0x2c1   :  { %v358_v16 = vmul.f32 1.442695, %v347_v14  ;;  %v354_v17 = vmul.f32 1.442695, %v345_v15 }
 0x2c3   :  { %679 = vpow2.f32 %v358_v16 }
 0x2c4   :  { %681 = vpow2.f32 %v354_v17 }
 0x2c8   :  { %v340_v18 = vpop.xlane.xlu1 %339 }
 0x2c9   :  { %v350_v19 = vsub.f32 %v318_v59, %v340_v18 }
 0x2ca   :  { %v843_v20 = vpop.eup %675  ;;  %v334_v21 = vpop.xlane.xlu0 %333 }
 0x2cb   :  { %v364_v22 = vmul.f32 1.442695, %v350_v19  ;;  %v348_v23 = vsub.f32 %v316_v62, %v334_v21  ;;  %v374_v24 = vsel %vm164_vm0, %v843_v20, 0.0 }
 0x2cc   :  { %v678_v26 = vpop.eup %677  ;;  %375 = vadd.xlane.f32.xlu1 %v374_v24  ;;  %v415_v27 = vpop.permute.xlu1 %414 }
 0x2cd   :  { %683 = vpow2.f32 %v364_v22  ;;  %v360_v28 = vmul.f32 1.442695, %v348_v23  ;;  %642 = vmatprep.subr.bf16.mxu1 %v415_v27  ;;  %v368_v32 = vsel %vm164_vm0, %v678_v26, 0.0 }
 0x2ce   :  { %643 = vmatpush3.bf16.msra.mxu1 %v415_v27  ;;  %v337_v30 = vpop.xlane.xlu0 %336 }
 0x2cf   :  { %685 = vpow2.f32 %v360_v28  ;;  %v349_v34 = vsub.f32 %v317_v2, %v337_v30 }
 0x2d0   :  { %v680_v33 = vpop.eup %679  ;;  %369 = vadd.xlane.f32.xlu1 %v368_v32 }
 0x2d1   :  { %v377_v35 = vsel %vm164_vm0, %v680_v33, 0.0  ;;  %v682_v36 = vpop.eup %681  ;;  %v362_v39 = vmul.f32 1.442695, %v349_v34 }
 0x2d2   :  { %378 = vadd.xlane.f32.xlu0 %v377_v35  ;;  %v343_v37 = vpop.xlane.xlu0 %342  ;;  %v371_v41 = vsel %vm164_vm0, %v682_v36, 0.0 }
 0x2d3   :  { %v351_v38 = vsub.f32 %v319_v4, %v343_v37 }
 0x2d5   :  { %v366_v40 = vmul.f32 1.442695, %v351_v38 }
 0x2d6   :  { %372 = vadd.xlane.f32.xlu0 %v371_v41 }
 0x2d7   :  { %687 = vpow2.f32 %v366_v40 }
 0x2d8   :  { %689 = vpow2.f32 %v362_v39 }
 0x2da   :  { %v684_v42 = vpop.eup %683 }
 0x2db   :  { %v386_v43 = vsel %vm164_vm0, %v684_v42, 0.0 }
 0x2dc   :  { %v686_v44 = vpop.eup %685  ;;  %387 = vadd.xlane.f32.xlu1 %v386_v43 }
 0x2dd   :  { %v380_v45 = vsel %vm164_vm0, %v686_v44, 0.0 }
 0x2e0   :  { %381 = vadd.xlane.f32.xlu1 %v380_v45 }
 0x2e4   :  { %v688_v46 = vpop.eup %687 }
 0x2e5   :  { %v389_v47 = vsel %vm164_vm0, %v688_v46, 0.0  ;;  %v690_v48 = vpop.eup %689 }
 0x2e6   :  { %390 = vadd.xlane.f32.xlu0 %v389_v47  ;;  %v383_v49 = vsel %vm164_vm0, %v690_v48, 0.0 }
 0x2ea   :  { %384 = vadd.xlane.f32.xlu0 %v383_v49 }
 0x2f1   :  { %412 = vrot.lane.b32.xlu1 %v799_v25, %s730_s0 }
 0x2f5   :  { %473 = vrot.lane.b32.xlu1 %v808_v31, %s730_s0 }
 0x300   :  { %475 = vrot.lane.b32.xlu0 %v805_v29, %s730_s0 }
 0x355   :  { %v376_v50 = vpop.xlane.xlu1 %375 }
 0x359   :  { %v370_v51 = vpop.xlane.xlu1 %369 }
 0x35b   :  { %v379_v52 = vpop.xlane.xlu0 %378 }
 0x35c   :  { %691 = vrcp.f32 %v379_v52 }
 0x35d   :  { %693 = vrcp.f32 %v370_v51 }
 0x35e   :  { %695 = vrcp.f32 %v376_v50 }
 0x35f   :  { %v373_v53 = vpop.xlane.xlu0 %372 }
 0x360   :  { %697 = vrcp.f32 %v373_v53 }
 0x365   :  { %v388_v54 = vpop.xlane.xlu1 %387 }
 0x369   :  { %v382_v55 = vpop.xlane.xlu1 %381  ;;  %v692_v56 = vpop.eup %691 }
 0x36a   :  { %v694_v57 = vpop.eup %693  ;;  %v403_v60 = vmul.f32 %v692_v56, %v680_v33 }
 0x36b   :  { %v696_v58 = vpop.eup %695  ;;  %v400_v31 = vmul.f32 %v694_v57, %v678_v26 }
 0x36c   :  { %v402_v62 = vmul.f32 %v696_v58, %v843_v20 }
 0x36d   :  { %v698_v25 = vpop.eup %697  ;;  %v413_v59 = vpop.permute.xlu1 %412 }
 0x36e   :  { %644 = vmatprep.subr.bf16.mxu1 %v413_v59  ;;  %v401_v61 = vmul.f32 %v698_v25, %v682_v36  ;;  %v409_v0 = vpack.c.bf16 %v403_v60, %v402_v62 }
 0x36f   :  { %645 = vmatpush3.bf16.msra.mxu1 %v413_v59  ;;  %v391_v29 = vpop.xlane.xlu0 %390 }
 0x370   :  { %v408_v63 = vpack.c.bf16 %v401_v61, %v400_v31  ;;  %699 = vrcp.f32 %v391_v29 }
 0x371   :  { %701 = vrcp.f32 %v382_v55  ;;  %v474_v3 = vpop.permute.xlu1 %473 }
 0x372   :  { %646 = vmatprep.mubr.msk.bf16.mxu1 %vm164_vm0, %v408_v63  ;;  %703 = vrcp.f32 %v388_v54 }
 0x373   :  { %647 = vmatmul.mubr.msk.bf16.vlgmr.msra.gmra.mxu1 %vm164_vm0, %v409_v0  ;;  %v385_v1 = vpop.xlane.xlu0 %384 }
 0x374   :  { %705 = vrcp.f32 %v385_v1 }
 0x377   :  { %v476_v2 = vpop.permute.xlu0 %475 }
 0x378   :  { %650 = vmatprep.subr.bf16.mxu0 %v476_v2 }
 0x379   :  { %651 = vmatpush3.bf16.msra.mxu0 %v476_v2 }
 0x37a   :  { %652 = vmatprep.subr.bf16.mxu0 %v474_v3 }
 0x37d   :  { %653 = vmatpush3.bf16.msra.mxu0 %v474_v3  ;;  %v700_v4 = vpop.eup %699 }
 0x37e   :  { %v702_v5 = vpop.eup %701  ;;  %v407_v8 = vmul.f32 %v700_v4, %v688_v46 }
 0x37f   :  { %v704_v6 = vpop.eup %703  ;;  %v404_v9 = vmul.f32 %v702_v5, %v686_v44 }
 0x380   :  { %v406_v11 = vmul.f32 %v704_v6, %v684_v42 }
 0x381   :  { %v706_v7 = vpop.eup %705 }
 0x382   :  { %v405_v10 = vmul.f32 %v706_v7, %v690_v48  ;;  %v411_v13 = vpack.c.bf16 %v407_v8, %v406_v11 }
 0x384   :  { %v410_v12 = vpack.c.bf16 %v405_v10, %v404_v9 }
 0x386   :  { %654 = vmatprep.mubr.msk.bf16.mxu0 %vm164_vm0, %v410_v12 }
 0x387   :  { %655 = vmatmul.mubr.msk.bf16.vlgmr.msra.gmra.mxu0 %vm164_vm0, %v411_v13 }
 0x433   :  { %v648_v14 = vpop.f32.mrf.mxu1 }
 0x434   :  { %536 = vst.msk [vmem:[#allocation2 + $0x10] sm:$0xff] %vm164_vm0, %v648_v14 }
 0x435   :  { %v458_v15 = vpop.f32.mrf.mxu1 }
 0x436   :  { %534 = vst.msk [vmem:[#allocation2] sm:$0xff] %vm164_vm0, %v458_v15 }
 0x437   :  { %v649_v16 = vpop.f32.mrf.mxu1 }
 0x438   :  { %537 = vst.msk [vmem:[#allocation2 + $0x18] sm:$0xff] %vm164_vm0, %v649_v16 }
 0x439   :  { %v461_v17 = vpop.f32.mrf.mxu1 }
 0x43a   :  { %535 = vst.msk [vmem:[#allocation2 + $0x8] sm:$0xff] %vm164_vm0, %v461_v17 }
 0x447   :  { %v656_v18 = vpop.f32.mrf.mxu0 }
 0x448   :  { %540 = vst.msk [vmem:[#allocation2 + $0x30] sm:$0xff] %vm164_vm0, %v656_v18 }
 0x449   :  { %v519_v19 = vpop.f32.mrf.mxu0 }
 0x44a   :  { %538 = vst.msk [vmem:[#allocation2 + $0x20] sm:$0xff] %vm164_vm0, %v519_v19 }
 0x44b   :  { %v657_v20 = vpop.f32.mrf.mxu0 }
 0x44c   :  { %541 = vst.msk [vmem:[#allocation2 + $0x38] sm:$0xff] %vm164_vm0, %v657_v20 }
 0x44d   :  { %v522_v21 = vpop.f32.mrf.mxu0 }
 0x44e   :  { %539 = vst.msk [vmem:[#allocation2 + $0x28] sm:$0xff] %vm164_vm0, %v522_v21 }
 0x44f   :  { %718 = shalt.err (!%p715_p4)
}
 0x450   :  { %s732_s16 = smov 128   ;;  %s733_s17 = smov 8  }
 0x451   :  { %553 = dma.vmem_to_hbm [thread:$0]  %s548_s14, 1024, %s878_s2, [#allocation3], %s732_s16, %s732_s16, %s733_s17  }
 0x452   :  { %727 = dma.done.wait [#allocation3], 1024  }
 0x453   :  { %728 = vsyncadd [#allocation3], 4294966272 }
 0x454   :  { %557 = vsyncpa [#allocation3], 1 }

</bundles_post_ra>
